<compile_context>
chip_gen: v5e
topology: v5e:2x2
jax: 0.10.0
libtpu: 0.0.40
codegen_flags: <defaults>
</compile_context>

<pallas_src>
import jax
import jax.numpy as jnp
from jax import lax
from jax.experimental import pallas as pl
from jax.experimental.pallas import tpu as pltpu

# Problem sizes (small, consistent with the module's forward).
N, CIN, H, W = 2, 4, 16, 16
HIDDEN = 32
NUM_CLASSES = 8
KH = KW = 3                      # 3x3 backbone conv, stride 1, padding 1
K1 = KH * KW * CIN               # 36  — im2col contraction dimension
K1A = K1 + 1                     # 37  — + ones row carrying b1
HW = H * W                       # 256 — per-image spatial (lane) extent
M = N * HW                       # 512 — flattened (batch, spatial) lane axis
LPAD = 128                       # lane zero-padding (128-aligned concat pieces)
W_BITS = W.bit_length() - 1      # W = 16 = 2**4 (power of two -> bit tricks)


def _fused_segmentor_kernel(x_ref, mean_ref, w1t_ref, w2t_ref, b2_ref,
                            o_ref, patch_ref):
    # x_ref    : (N, CIN, HW)          raw NCHW input, spatial flattened
    # mean_ref : (CIN, 1)              pixel_mean
    # w1t_ref  : (HIDDEN, K1A)         3x3 weights, 1/std folded, transposed;
    #                                  last column = b1
    # w2t_ref  : (NUM_CLASSES, HIDDEN) 1x1 head weights, transposed
    # b2_ref   : (NUM_CLASSES, 1)
    # o_ref    : (N, NUM_CLASSES, HW)  NCHW logits, spatial flattened (lane-dense)
    # patch_ref: (K1A, M)              VMEM scratch for the in-kernel im2col

    # Center the input (1/std is folded into w1t) and lay both images out on a
    # single lane axis, flanked by 128-wide zero pads so every 3x3 tap is a
    # static lane slice.  Column order: p = n*HW + h*W + w.
    zpad = jnp.zeros((CIN, LPAD), jnp.float32)
    imgs = [x_ref[n] - mean_ref[...] for n in range(N)]          # N x (CIN, HW)
    xp = jnp.concatenate([zpad] + imgs + [zpad], axis=1)         # (CIN, 2*LPAD+M)

    # (h, w) coordinates of every output column (cheap int bit ops on iota).
    pos = lax.broadcasted_iota(jnp.int32, (1, M), 1)
    hw = jnp.bitwise_and(pos, HW - 1)
    hh = jnp.right_shift(hw, W_BITS)
    ww = jnp.bitwise_and(hw, W - 1)

    # Build the im2col matrix in VMEM: rows ordered (dy, dx, c) to match w1's
    # HWIO reshape, plus a ones row (b1 is pre-folded into w1t's last column).
    # Border masks zero out taps that fall in the SAME-padding halo; they also
    # kill any would-be cross-image / cross-row leakage of the flat slices.
    t = 0
    for dy in range(KH):
        for dx in range(KW):
            oy, ox = dy - 1, dx - 1
            off = oy * W + ox
            slab = xp[:, LPAD + off:LPAD + off + M]              # (CIN, M)
            valid = ((hh + oy >= 0) & (hh + oy < H) &
                     (ww + ox >= 0) & (ww + ox < W))
            patch_ref[t * CIN:(t + 1) * CIN, :] = jnp.where(valid, slab, 0.0)
            t += 1
    patch_ref[K1:K1A, :] = jnp.ones((1, M), jnp.float32)

    # Fused conv(3x3)+bias+ReLU and 1x1 head as two MXU matmuls.
    featT = jnp.dot(w1t_ref[...], patch_ref[...],
                    preferred_element_type=jnp.float32)          # (HIDDEN, M)
    featT = jnp.maximum(featT, 0.0)                              # b1 already added
    logitsT = jnp.dot(w2t_ref[...], featT,
                      preferred_element_type=jnp.float32) + b2_ref[...]

    # Static N=2 loop: 128-aligned lane slices -> full-width unmasked stores.
    for n in range(N):
        o_ref[n] = logitsT[:, n * HW:(n + 1) * HW]


_COST = pl.CostEstimate(
    flops=2 * K1A * HIDDEN * M + 2 * HIDDEN * NUM_CLASSES * M,
    transcendentals=0,
    bytes_accessed=4 * (N * CIN * HW + CIN + HIDDEN * K1A
                        + NUM_CLASSES * HIDDEN + NUM_CLASSES
                        + N * NUM_CLASSES * HW),
)

_fused_call = pl.pallas_call(
    _fused_segmentor_kernel,
    out_shape=jax.ShapeDtypeStruct((N, NUM_CLASSES, HW), jnp.float32),
    scratch_shapes=[pltpu.VMEM((K1A, M), jnp.float32)],
    cost_estimate=_COST,
)


def fold_params(params):
    """One-time parameter folding — hoisted out of the per-call path."""
    mean, std, w1, b1, w2, b2 = (params[k] for k in
                                 ("mean", "std", "w1", "b1", "w2", "b2"))
    w1f = w1 * (1.0 / std)[None, None, :, None]              # fold 1/pixel_std
    w1t = w1f.reshape(K1, HIDDEN).T                          # (HIDDEN, 36), (dy,dx,c) cols
    w1t_aug = jnp.concatenate([w1t, b1[:, None]], axis=1)    # (HIDDEN, 37), b1 last col
    return {
        "mean_col": mean.reshape(CIN, 1),
        "w1t_aug": w1t_aug,
        "w2t": w2.T,                                         # (NUM_CLASSES, HIDDEN)
        "b2_col": b2.reshape(NUM_CLASSES, 1),
    }


@jax.jit
def model_wrapper_forward(x_nchw, folded):
    """Pallas forward. x_nchw: (N, CIN, H, W) f32 -> (N, NUM_CLASSES, H, W) f32."""
    x = x_nchw.astype(jnp.float32).reshape(N, CIN, HW)       # free reshape only
    out = _fused_call(x, folded["mean_col"], folded["w1t_aug"],
                      folded["w2t"], folded["b2_col"])
    return out.reshape(N, NUM_CLASSES, H, W)                 # free reshape only


def reference_forward(x_nchw, params):
    """Pure-JAX reference of the same forward pass (for verification)."""
    mean, std, w1, b1, w2, b2 = (params[k] for k in
                                 ("mean", "std", "w1", "b1", "w2", "b2"))
    x = jnp.transpose(x_nchw, (0, 2, 3, 1)).astype(jnp.float32)
    xn = (x - mean.reshape(1, 1, 1, CIN)) / std.reshape(1, 1, 1, CIN)
    f = lax.conv_general_dilated(
        xn, w1, window_strides=(1, 1), padding="SAME",
        dimension_numbers=("NHWC", "HWIO", "NHWC"),
        precision=lax.Precision.HIGHEST) + b1
    f = jnp.maximum(f, 0.0)
    logits = jnp.einsum("nhwc,cd->nhwd", f, w2,
                        precision=lax.Precision.HIGHEST) + b2
    return jnp.transpose(logits, (0, 3, 1, 2))


def make_params(key):
    """Deterministic synthetic segmentor parameters."""
    k_mean, k_std, k_w1, k_b1, k_w2, k_b2 = jax.random.split(key, 6)
    return {
        "mean": jax.random.normal(k_mean, (CIN,), jnp.float32) * 0.5,
        "std": jax.random.uniform(k_std, (CIN,), jnp.float32,
                                  minval=0.5, maxval=1.5),
        "w1": jax.random.normal(k_w1, (KH, KW, CIN, HIDDEN), jnp.float32) * 0.1,
        "b1": jax.random.normal(k_b1, (HIDDEN,), jnp.float32) * 0.1,
        "w2": jax.random.normal(k_w2, (HIDDEN, NUM_CLASSES), jnp.float32) * 0.1,
        "b2": jax.random.normal(k_b2, (NUM_CLASSES,), jnp.float32) * 0.1,
    }


if __name__ == "__main__":
    root = jax.random.PRNGKey(0)
    k_params, k_x = jax.random.split(root, 2)
    params = make_params(k_params)
    folded = fold_params(params)                     # runs once, not per forward
    x = jax.random.normal(k_x, (N, CIN, H, W), jnp.float32)

    out = jax.block_until_ready(model_wrapper_forward(x, folded))
    ref = jax.block_until_ready(reference_forward(x, params))

    assert out.shape == (N, NUM_CLASSES, H, W), out.shape
    # Tolerance accommodates MXU f32 multi-pass rounding vs the HIGHEST-precision
    # XLA reference; any structural/math error would be O(0.1) or larger.
    max_err = float(jnp.max(jnp.abs(out - ref)))
    assert jnp.allclose(out, ref, atol=1e-3, rtol=1e-3), max_err
    print("KERNEL_OK")
</pallas_src>

<mosaic_0001>
module attributes {stable_mosaic.version = 11 : i64} {
  func.func @_fused_segmentor_kernel(%arg0: memref<2x4x256xf32, #tpu.memory_space<vmem>>, %arg1: memref<4x1xf32, #tpu.memory_space<vmem>>, %arg2: memref<32x37xf32, #tpu.memory_space<vmem>>, %arg3: memref<8x32xf32, #tpu.memory_space<vmem>>, %arg4: memref<8x1xf32, #tpu.memory_space<vmem>>, %arg5: memref<2x8x256xf32, #tpu.memory_space<vmem>>, %arg6: memref<37x512xf32, #tpu.memory_space<vmem>>) attributes {dimension_semantics = [], scalar_prefetch = 0 : i64, scratch_operands = 1 : i64, tpu.core_type = #tpu.core_type<tc>} {
    %cst = arith.constant 0.000000e+00 : f32
    %0 = vector.broadcast %cst : f32 to vector<4x128xf32>
    %c0 = arith.constant 0 : index
    %c0_0 = arith.constant 0 : index
    %c0_1 = arith.constant 0 : index
    %1 = vector.load %arg0[%c0, %c0_0, %c0_1] : memref<2x4x256xf32, #tpu.memory_space<vmem>>, vector<1x4x256xf32>
    %2 = vector.shape_cast %1 : vector<1x4x256xf32> to vector<4x256xf32>
    %c0_2 = arith.constant 0 : index
    %c0_3 = arith.constant 0 : index
    %3 = vector.load %arg1[%c0_2, %c0_3] : memref<4x1xf32, #tpu.memory_space<vmem>>, vector<4x1xf32>
    %4 = vector.broadcast %3 : vector<4x1xf32> to vector<4x256xf32>
    %5 = arith.subf %2, %4 : vector<4x256xf32>
    %c1 = arith.constant 1 : index
    %c0_4 = arith.constant 0 : index
    %c0_5 = arith.constant 0 : index
    %6 = vector.load %arg0[%c1, %c0_4, %c0_5] : memref<2x4x256xf32, #tpu.memory_space<vmem>>, vector<1x4x256xf32>
    %7 = vector.shape_cast %6 : vector<1x4x256xf32> to vector<4x256xf32>
    %c0_6 = arith.constant 0 : index
    %c0_7 = arith.constant 0 : index
    %8 = vector.load %arg1[%c0_6, %c0_7] : memref<4x1xf32, #tpu.memory_space<vmem>>, vector<4x1xf32>
    %9 = vector.broadcast %8 : vector<4x1xf32> to vector<4x256xf32>
    %10 = arith.subf %7, %9 : vector<4x256xf32>
    %11 = tpu.concatenate %0, %5, %10, %0 in 1 : vector<4x128xf32>, vector<4x256xf32>, vector<4x256xf32>, vector<4x128xf32> -> vector<4x768xf32>
    %12 = tpu.iota {dimensions = array<i32: 1>} : vector<1x512xi32>
    %c255_i32 = arith.constant 255 : i32
    %13 = vector.broadcast %c255_i32 : i32 to vector<1x512xi32>
    %14 = arith.andi %12, %13 : vector<1x512xi32>
    %c4_i32 = arith.constant 4 : i32
    %15 = vector.broadcast %c4_i32 : i32 to vector<1x512xi32>
    %16 = arith.shrsi %14, %15 : vector<1x512xi32>
    %c15_i32 = arith.constant 15 : i32
    %17 = vector.broadcast %c15_i32 : i32 to vector<1x512xi32>
    %18 = arith.andi %14, %17 : vector<1x512xi32>
    %19 = vector.extract_strided_slice %11 {offsets = [0, 111], sizes = [4, 512], strides = [1, 1]} : vector<4x768xf32> to vector<4x512xf32>
    %c-1_i32 = arith.constant -1 : i32
    %20 = vector.broadcast %c-1_i32 : i32 to vector<1x512xi32>
    %21 = arith.addi %16, %20 : vector<1x512xi32>
    %c0_i32 = arith.constant 0 : i32
    %22 = vector.broadcast %c0_i32 : i32 to vector<1x512xi32>
    %23 = arith.cmpi sge, %21, %22 : vector<1x512xi32>
    %c-1_i32_8 = arith.constant -1 : i32
    %24 = vector.broadcast %c-1_i32_8 : i32 to vector<1x512xi32>
    %25 = arith.addi %16, %24 : vector<1x512xi32>
    %c16_i32 = arith.constant 16 : i32
    %26 = vector.broadcast %c16_i32 : i32 to vector<1x512xi32>
    %27 = arith.cmpi slt, %25, %26 : vector<1x512xi32>
    %28 = arith.andi %23, %27 : vector<1x512xi1>
    %c-1_i32_9 = arith.constant -1 : i32
    %29 = vector.broadcast %c-1_i32_9 : i32 to vector<1x512xi32>
    %30 = arith.addi %18, %29 : vector<1x512xi32>
    %c0_i32_10 = arith.constant 0 : i32
    %31 = vector.broadcast %c0_i32_10 : i32 to vector<1x512xi32>
    %32 = arith.cmpi sge, %30, %31 : vector<1x512xi32>
    %33 = arith.andi %28, %32 : vector<1x512xi1>
    %c-1_i32_11 = arith.constant -1 : i32
    %34 = vector.broadcast %c-1_i32_11 : i32 to vector<1x512xi32>
    %35 = arith.addi %18, %34 : vector<1x512xi32>
    %c16_i32_12 = arith.constant 16 : i32
    %36 = vector.broadcast %c16_i32_12 : i32 to vector<1x512xi32>
    %37 = arith.cmpi slt, %35, %36 : vector<1x512xi32>
    %38 = arith.andi %33, %37 : vector<1x512xi1>
    %cst_13 = arith.constant 0.000000e+00 : f32
    %39 = vector.shape_cast %38 : vector<1x512xi1> to vector<1x512xi1>
    %40 = vector.broadcast %39 : vector<1x512xi1> to vector<4x512xi1>
    %41 = vector.broadcast %cst_13 : f32 to vector<4x512xf32>
    %42 = arith.select %40, %19, %41 : vector<4x512xi1>, vector<4x512xf32>
    %c0_14 = arith.constant 0 : index
    %c0_15 = arith.constant 0 : index
    %43 = vector.load %arg6[%c0_14, %c0_15] : memref<37x512xf32, #tpu.memory_space<vmem>>, vector<4x512xf32>
    tpu.vector_store %arg6[%c0_14, %c0_15], %42 {strides = array<i32>} : memref<37x512xf32, #tpu.memory_space<vmem>>, vector<4x512xf32>,
    %44 = vector.extract_strided_slice %11 {offsets = [0, 112], sizes = [4, 512], strides = [1, 1]} : vector<4x768xf32> to vector<4x512xf32>
    %c-1_i32_16 = arith.constant -1 : i32
    %45 = vector.broadcast %c-1_i32_16 : i32 to vector<1x512xi32>
    %46 = arith.addi %16, %45 : vector<1x512xi32>
    %c0_i32_17 = arith.constant 0 : i32
    %47 = vector.broadcast %c0_i32_17 : i32 to vector<1x512xi32>
    %48 = arith.cmpi sge, %46, %47 : vector<1x512xi32>
    %c-1_i32_18 = arith.constant -1 : i32
    %49 = vector.broadcast %c-1_i32_18 : i32 to vector<1x512xi32>
    %50 = arith.addi %16, %49 : vector<1x512xi32>
    %c16_i32_19 = arith.constant 16 : i32
    %51 = vector.broadcast %c16_i32_19 : i32 to vector<1x512xi32>
    %52 = arith.cmpi slt, %50, %51 : vector<1x512xi32>
    %53 = arith.andi %48, %52 : vector<1x512xi1>
    %c0_i32_20 = arith.constant 0 : i32
    %54 = vector.broadcast %c0_i32_20 : i32 to vector<1x512xi32>
    %55 = arith.addi %18, %54 : vector<1x512xi32>
    %c0_i32_21 = arith.constant 0 : i32
    %56 = vector.broadcast %c0_i32_21 : i32 to vector<1x512xi32>
    %57 = arith.cmpi sge, %55, %56 : vector<1x512xi32>
    %58 = arith.andi %53, %57 : vector<1x512xi1>
    %c0_i32_22 = arith.constant 0 : i32
    %59 = vector.broadcast %c0_i32_22 : i32 to vector<1x512xi32>
    %60 = arith.addi %18, %59 : vector<1x512xi32>
    %c16_i32_23 = arith.constant 16 : i32
    %61 = vector.broadcast %c16_i32_23 : i32 to vector<1x512xi32>
    %62 = arith.cmpi slt, %60, %61 : vector<1x512xi32>
    %63 = arith.andi %58, %62 : vector<1x512xi1>
    %cst_24 = arith.constant 0.000000e+00 : f32
    %64 = vector.shape_cast %63 : vector<1x512xi1> to vector<1x512xi1>
    %65 = vector.broadcast %64 : vector<1x512xi1> to vector<4x512xi1>
    %66 = vector.broadcast %cst_24 : f32 to vector<4x512xf32>
    %67 = arith.select %65, %44, %66 : vector<4x512xi1>, vector<4x512xf32>
    %c4 = arith.constant 4 : index
    %c0_25 = arith.constant 0 : index
    %68 = vector.load %arg6[%c4, %c0_25] : memref<37x512xf32, #tpu.memory_space<vmem>>, vector<4x512xf32>
    tpu.vector_store %arg6[%c4, %c0_25], %67 {strides = array<i32>} : memref<37x512xf32, #tpu.memory_space<vmem>>, vector<4x512xf32>,
    %69 = vector.extract_strided_slice %11 {offsets = [0, 113], sizes = [4, 512], strides = [1, 1]} : vector<4x768xf32> to vector<4x512xf32>
    %c-1_i32_26 = arith.constant -1 : i32
    %70 = vector.broadcast %c-1_i32_26 : i32 to vector<1x512xi32>
    %71 = arith.addi %16, %70 : vector<1x512xi32>
    %c0_i32_27 = arith.constant 0 : i32
    %72 = vector.broadcast %c0_i32_27 : i32 to vector<1x512xi32>
    %73 = arith.cmpi sge, %71, %72 : vector<1x512xi32>
    %c-1_i32_28 = arith.constant -1 : i32
    %74 = vector.broadcast %c-1_i32_28 : i32 to vector<1x512xi32>
    %75 = arith.addi %16, %74 : vector<1x512xi32>
    %c16_i32_29 = arith.constant 16 : i32
    %76 = vector.broadcast %c16_i32_29 : i32 to vector<1x512xi32>
    %77 = arith.cmpi slt, %75, %76 : vector<1x512xi32>
    %78 = arith.andi %73, %77 : vector<1x512xi1>
    %c1_i32 = arith.constant 1 : i32
    %79 = vector.broadcast %c1_i32 : i32 to vector<1x512xi32>
    %80 = arith.addi %18, %79 : vector<1x512xi32>
    %c0_i32_30 = arith.constant 0 : i32
    %81 = vector.broadcast %c0_i32_30 : i32 to vector<1x512xi32>
    %82 = arith.cmpi sge, %80, %81 : vector<1x512xi32>
    %83 = arith.andi %78, %82 : vector<1x512xi1>
    %c1_i32_31 = arith.constant 1 : i32
    %84 = vector.broadcast %c1_i32_31 : i32 to vector<1x512xi32>
    %85 = arith.addi %18, %84 : vector<1x512xi32>
    %c16_i32_32 = arith.constant 16 : i32
    %86 = vector.broadcast %c16_i32_32 : i32 to vector<1x512xi32>
    %87 = arith.cmpi slt, %85, %86 : vector<1x512xi32>
    %88 = arith.andi %83, %87 : vector<1x512xi1>
    %cst_33 = arith.constant 0.000000e+00 : f32
    %89 = vector.shape_cast %88 : vector<1x512xi1> to vector<1x512xi1>
    %90 = vector.broadcast %89 : vector<1x512xi1> to vector<4x512xi1>
    %91 = vector.broadcast %cst_33 : f32 to vector<4x512xf32>
    %92 = arith.select %90, %69, %91 : vector<4x512xi1>, vector<4x512xf32>
    %c8 = arith.constant 8 : index
    %c0_34 = arith.constant 0 : index
    %93 = vector.load %arg6[%c8, %c0_34] : memref<37x512xf32, #tpu.memory_space<vmem>>, vector<4x512xf32>
    tpu.vector_store %arg6[%c8, %c0_34], %92 {strides = array<i32>} : memref<37x512xf32, #tpu.memory_space<vmem>>, vector<4x512xf32>,
    %94 = vector.extract_strided_slice %11 {offsets = [0, 127], sizes = [4, 512], strides = [1, 1]} : vector<4x768xf32> to vector<4x512xf32>
    %c0_i32_35 = arith.constant 0 : i32
    %95 = vector.broadcast %c0_i32_35 : i32 to vector<1x512xi32>
    %96 = arith.addi %16, %95 : vector<1x512xi32>
    %c0_i32_36 = arith.constant 0 : i32
    %97 = vector.broadcast %c0_i32_36 : i32 to vector<1x512xi32>
    %98 = arith.cmpi sge, %96, %97 : vector<1x512xi32>
    %c0_i32_37 = arith.constant 0 : i32
    %99 = vector.broadcast %c0_i32_37 : i32 to vector<1x512xi32>
    %100 = arith.addi %16, %99 : vector<1x512xi32>
    %c16_i32_38 = arith.constant 16 : i32
    %101 = vector.broadcast %c16_i32_38 : i32 to vector<1x512xi32>
    %102 = arith.cmpi slt, %100, %101 : vector<1x512xi32>
    %103 = arith.andi %98, %102 : vector<1x512xi1>
    %c-1_i32_39 = arith.constant -1 : i32
    %104 = vector.broadcast %c-1_i32_39 : i32 to vector<1x512xi32>
    %105 = arith.addi %18, %104 : vector<1x512xi32>
    %c0_i32_40 = arith.constant 0 : i32
    %106 = vector.broadcast %c0_i32_40 : i32 to vector<1x512xi32>
    %107 = arith.cmpi sge, %105, %106 : vector<1x512xi32>
    %108 = arith.andi %103, %107 : vector<1x512xi1>
    %c-1_i32_41 = arith.constant -1 : i32
    %109 = vector.broadcast %c-1_i32_41 : i32 to vector<1x512xi32>
    %110 = arith.addi %18, %109 : vector<1x512xi32>
    %c16_i32_42 = arith.constant 16 : i32
    %111 = vector.broadcast %c16_i32_42 : i32 to vector<1x512xi32>
    %112 = arith.cmpi slt, %110, %111 : vector<1x512xi32>
    %113 = arith.andi %108, %112 : vector<1x512xi1>
    %cst_43 = arith.constant 0.000000e+00 : f32
    %114 = vector.shape_cast %113 : vector<1x512xi1> to vector<1x512xi1>
    %115 = vector.broadcast %114 : vector<1x512xi1> to vector<4x512xi1>
    %116 = vector.broadcast %cst_43 : f32 to vector<4x512xf32>
    %117 = arith.select %115, %94, %116 : vector<4x512xi1>, vector<4x512xf32>
    %c12 = arith.constant 12 : index
    %c0_44 = arith.constant 0 : index
    %118 = vector.load %arg6[%c12, %c0_44] : memref<37x512xf32, #tpu.memory_space<vmem>>, vector<4x512xf32>
    tpu.vector_store %arg6[%c12, %c0_44], %117 {strides = array<i32>} : memref<37x512xf32, #tpu.memory_space<vmem>>, vector<4x512xf32>,
    %119 = vector.extract_strided_slice %11 {offsets = [0, 128], sizes = [4, 512], strides = [1, 1]} : vector<4x768xf32> to vector<4x512xf32>
    %c0_i32_45 = arith.constant 0 : i32
    %120 = vector.broadcast %c0_i32_45 : i32 to vector<1x512xi32>
    %121 = arith.addi %16, %120 : vector<1x512xi32>
    %c0_i32_46 = arith.constant 0 : i32
    %122 = vector.broadcast %c0_i32_46 : i32 to vector<1x512xi32>
    %123 = arith.cmpi sge, %121, %122 : vector<1x512xi32>
    %c0_i32_47 = arith.constant 0 : i32
    %124 = vector.broadcast %c0_i32_47 : i32 to vector<1x512xi32>
    %125 = arith.addi %16, %124 : vector<1x512xi32>
    %c16_i32_48 = arith.constant 16 : i32
    %126 = vector.broadcast %c16_i32_48 : i32 to vector<1x512xi32>
    %127 = arith.cmpi slt, %125, %126 : vector<1x512xi32>
    %128 = arith.andi %123, %127 : vector<1x512xi1>
    %c0_i32_49 = arith.constant 0 : i32
    %129 = vector.broadcast %c0_i32_49 : i32 to vector<1x512xi32>
    %130 = arith.addi %18, %129 : vector<1x512xi32>
    %c0_i32_50 = arith.constant 0 : i32
    %131 = vector.broadcast %c0_i32_50 : i32 to vector<1x512xi32>
    %132 = arith.cmpi sge, %130, %131 : vector<1x512xi32>
    %133 = arith.andi %128, %132 : vector<1x512xi1>
    %c0_i32_51 = arith.constant 0 : i32
    %134 = vector.broadcast %c0_i32_51 : i32 to vector<1x512xi32>
    %135 = arith.addi %18, %134 : vector<1x512xi32>
    %c16_i32_52 = arith.constant 16 : i32
    %136 = vector.broadcast %c16_i32_52 : i32 to vector<1x512xi32>
    %137 = arith.cmpi slt, %135, %136 : vector<1x512xi32>
    %138 = arith.andi %133, %137 : vector<1x512xi1>
    %cst_53 = arith.constant 0.000000e+00 : f32
    %139 = vector.shape_cast %138 : vector<1x512xi1> to vector<1x512xi1>
    %140 = vector.broadcast %139 : vector<1x512xi1> to vector<4x512xi1>
    %141 = vector.broadcast %cst_53 : f32 to vector<4x512xf32>
    %142 = arith.select %140, %119, %141 : vector<4x512xi1>, vector<4x512xf32>
    %c16 = arith.constant 16 : index
    %c0_54 = arith.constant 0 : index
    %143 = vector.load %arg6[%c16, %c0_54] : memref<37x512xf32, #tpu.memory_space<vmem>>, vector<4x512xf32>
    tpu.vector_store %arg6[%c16, %c0_54], %142 {strides = array<i32>} : memref<37x512xf32, #tpu.memory_space<vmem>>, vector<4x512xf32>,
    %144 = vector.extract_strided_slice %11 {offsets = [0, 129], sizes = [4, 512], strides = [1, 1]} : vector<4x768xf32> to vector<4x512xf32>
    %c0_i32_55 = arith.constant 0 : i32
    %145 = vector.broadcast %c0_i32_55 : i32 to vector<1x512xi32>
    %146 = arith.addi %16, %145 : vector<1x512xi32>
    %c0_i32_56 = arith.constant 0 : i32
    %147 = vector.broadcast %c0_i32_56 : i32 to vector<1x512xi32>
    %148 = arith.cmpi sge, %146, %147 : vector<1x512xi32>
    %c0_i32_57 = arith.constant 0 : i32
    %149 = vector.broadcast %c0_i32_57 : i32 to vector<1x512xi32>
    %150 = arith.addi %16, %149 : vector<1x512xi32>
    %c16_i32_58 = arith.constant 16 : i32
    %151 = vector.broadcast %c16_i32_58 : i32 to vector<1x512xi32>
    %152 = arith.cmpi slt, %150, %151 : vector<1x512xi32>
    %153 = arith.andi %148, %152 : vector<1x512xi1>
    %c1_i32_59 = arith.constant 1 : i32
    %154 = vector.broadcast %c1_i32_59 : i32 to vector<1x512xi32>
    %155 = arith.addi %18, %154 : vector<1x512xi32>
    %c0_i32_60 = arith.constant 0 : i32
    %156 = vector.broadcast %c0_i32_60 : i32 to vector<1x512xi32>
    %157 = arith.cmpi sge, %155, %156 : vector<1x512xi32>
    %158 = arith.andi %153, %157 : vector<1x512xi1>
    %c1_i32_61 = arith.constant 1 : i32
    %159 = vector.broadcast %c1_i32_61 : i32 to vector<1x512xi32>
    %160 = arith.addi %18, %159 : vector<1x512xi32>
    %c16_i32_62 = arith.constant 16 : i32
    %161 = vector.broadcast %c16_i32_62 : i32 to vector<1x512xi32>
    %162 = arith.cmpi slt, %160, %161 : vector<1x512xi32>
    %163 = arith.andi %158, %162 : vector<1x512xi1>
    %cst_63 = arith.constant 0.000000e+00 : f32
    %164 = vector.shape_cast %163 : vector<1x512xi1> to vector<1x512xi1>
    %165 = vector.broadcast %164 : vector<1x512xi1> to vector<4x512xi1>
    %166 = vector.broadcast %cst_63 : f32 to vector<4x512xf32>
    %167 = arith.select %165, %144, %166 : vector<4x512xi1>, vector<4x512xf32>
    %c20 = arith.constant 20 : index
    %c0_64 = arith.constant 0 : index
    %168 = vector.load %arg6[%c20, %c0_64] : memref<37x512xf32, #tpu.memory_space<vmem>>, vector<4x512xf32>
    tpu.vector_store %arg6[%c20, %c0_64], %167 {strides = array<i32>} : memref<37x512xf32, #tpu.memory_space<vmem>>, vector<4x512xf32>,
    %169 = vector.extract_strided_slice %11 {offsets = [0, 143], sizes = [4, 512], strides = [1, 1]} : vector<4x768xf32> to vector<4x512xf32>
    %c1_i32_65 = arith.constant 1 : i32
    %170 = vector.broadcast %c1_i32_65 : i32 to vector<1x512xi32>
    %171 = arith.addi %16, %170 : vector<1x512xi32>
    %c0_i32_66 = arith.constant 0 : i32
    %172 = vector.broadcast %c0_i32_66 : i32 to vector<1x512xi32>
    %173 = arith.cmpi sge, %171, %172 : vector<1x512xi32>
    %c1_i32_67 = arith.constant 1 : i32
    %174 = vector.broadcast %c1_i32_67 : i32 to vector<1x512xi32>
    %175 = arith.addi %16, %174 : vector<1x512xi32>
    %c16_i32_68 = arith.constant 16 : i32
    %176 = vector.broadcast %c16_i32_68 : i32 to vector<1x512xi32>
    %177 = arith.cmpi slt, %175, %176 : vector<1x512xi32>
    %178 = arith.andi %173, %177 : vector<1x512xi1>
    %c-1_i32_69 = arith.constant -1 : i32
    %179 = vector.broadcast %c-1_i32_69 : i32 to vector<1x512xi32>
    %180 = arith.addi %18, %179 : vector<1x512xi32>
    %c0_i32_70 = arith.constant 0 : i32
    %181 = vector.broadcast %c0_i32_70 : i32 to vector<1x512xi32>
    %182 = arith.cmpi sge, %180, %181 : vector<1x512xi32>
    %183 = arith.andi %178, %182 : vector<1x512xi1>
    %c-1_i32_71 = arith.constant -1 : i32
    %184 = vector.broadcast %c-1_i32_71 : i32 to vector<1x512xi32>
    %185 = arith.addi %18, %184 : vector<1x512xi32>
    %c16_i32_72 = arith.constant 16 : i32
    %186 = vector.broadcast %c16_i32_72 : i32 to vector<1x512xi32>
    %187 = arith.cmpi slt, %185, %186 : vector<1x512xi32>
    %188 = arith.andi %183, %187 : vector<1x512xi1>
    %cst_73 = arith.constant 0.000000e+00 : f32
    %189 = vector.shape_cast %188 : vector<1x512xi1> to vector<1x512xi1>
    %190 = vector.broadcast %189 : vector<1x512xi1> to vector<4x512xi1>
    %191 = vector.broadcast %cst_73 : f32 to vector<4x512xf32>
    %192 = arith.select %190, %169, %191 : vector<4x512xi1>, vector<4x512xf32>
    %c24 = arith.constant 24 : index
    %c0_74 = arith.constant 0 : index
    %193 = vector.load %arg6[%c24, %c0_74] : memref<37x512xf32, #tpu.memory_space<vmem>>, vector<4x512xf32>
    tpu.vector_store %arg6[%c24, %c0_74], %192 {strides = array<i32>} : memref<37x512xf32, #tpu.memory_space<vmem>>, vector<4x512xf32>,
    %194 = vector.extract_strided_slice %11 {offsets = [0, 144], sizes = [4, 512], strides = [1, 1]} : vector<4x768xf32> to vector<4x512xf32>
    %c1_i32_75 = arith.constant 1 : i32
    %195 = vector.broadcast %c1_i32_75 : i32 to vector<1x512xi32>
    %196 = arith.addi %16, %195 : vector<1x512xi32>
    %c0_i32_76 = arith.constant 0 : i32
    %197 = vector.broadcast %c0_i32_76 : i32 to vector<1x512xi32>
    %198 = arith.cmpi sge, %196, %197 : vector<1x512xi32>
    %c1_i32_77 = arith.constant 1 : i32
    %199 = vector.broadcast %c1_i32_77 : i32 to vector<1x512xi32>
    %200 = arith.addi %16, %199 : vector<1x512xi32>
    %c16_i32_78 = arith.constant 16 : i32
    %201 = vector.broadcast %c16_i32_78 : i32 to vector<1x512xi32>
    %202 = arith.cmpi slt, %200, %201 : vector<1x512xi32>
    %203 = arith.andi %198, %202 : vector<1x512xi1>
    %c0_i32_79 = arith.constant 0 : i32
    %204 = vector.broadcast %c0_i32_79 : i32 to vector<1x512xi32>
    %205 = arith.addi %18, %204 : vector<1x512xi32>
    %c0_i32_80 = arith.constant 0 : i32
    %206 = vector.broadcast %c0_i32_80 : i32 to vector<1x512xi32>
    %207 = arith.cmpi sge, %205, %206 : vector<1x512xi32>
    %208 = arith.andi %203, %207 : vector<1x512xi1>
    %c0_i32_81 = arith.constant 0 : i32
    %209 = vector.broadcast %c0_i32_81 : i32 to vector<1x512xi32>
    %210 = arith.addi %18, %209 : vector<1x512xi32>
    %c16_i32_82 = arith.constant 16 : i32
    %211 = vector.broadcast %c16_i32_82 : i32 to vector<1x512xi32>
    %212 = arith.cmpi slt, %210, %211 : vector<1x512xi32>
    %213 = arith.andi %208, %212 : vector<1x512xi1>
    %cst_83 = arith.constant 0.000000e+00 : f32
    %214 = vector.shape_cast %213 : vector<1x512xi1> to vector<1x512xi1>
    %215 = vector.broadcast %214 : vector<1x512xi1> to vector<4x512xi1>
    %216 = vector.broadcast %cst_83 : f32 to vector<4x512xf32>
    %217 = arith.select %215, %194, %216 : vector<4x512xi1>, vector<4x512xf32>
    %c28 = arith.constant 28 : index
    %c0_84 = arith.constant 0 : index
    %218 = vector.load %arg6[%c28, %c0_84] : memref<37x512xf32, #tpu.memory_space<vmem>>, vector<4x512xf32>
    tpu.vector_store %arg6[%c28, %c0_84], %217 {strides = array<i32>} : memref<37x512xf32, #tpu.memory_space<vmem>>, vector<4x512xf32>,
    %219 = vector.extract_strided_slice %11 {offsets = [0, 145], sizes = [4, 512], strides = [1, 1]} : vector<4x768xf32> to vector<4x512xf32>
    %c1_i32_85 = arith.constant 1 : i32
    %220 = vector.broadcast %c1_i32_85 : i32 to vector<1x512xi32>
    %221 = arith.addi %16, %220 : vector<1x512xi32>
    %c0_i32_86 = arith.constant 0 : i32
    %222 = vector.broadcast %c0_i32_86 : i32 to vector<1x512xi32>
    %223 = arith.cmpi sge, %221, %222 : vector<1x512xi32>
    %c1_i32_87 = arith.constant 1 : i32
    %224 = vector.broadcast %c1_i32_87 : i32 to vector<1x512xi32>
    %225 = arith.addi %16, %224 : vector<1x512xi32>
    %c16_i32_88 = arith.constant 16 : i32
    %226 = vector.broadcast %c16_i32_88 : i32 to vector<1x512xi32>
    %227 = arith.cmpi slt, %225, %226 : vector<1x512xi32>
    %228 = arith.andi %223, %227 : vector<1x512xi1>
    %c1_i32_89 = arith.constant 1 : i32
    %229 = vector.broadcast %c1_i32_89 : i32 to vector<1x512xi32>
    %230 = arith.addi %18, %229 : vector<1x512xi32>
    %c0_i32_90 = arith.constant 0 : i32
    %231 = vector.broadcast %c0_i32_90 : i32 to vector<1x512xi32>
    %232 = arith.cmpi sge, %230, %231 : vector<1x512xi32>
    %233 = arith.andi %228, %232 : vector<1x512xi1>
    %c1_i32_91 = arith.constant 1 : i32
    %234 = vector.broadcast %c1_i32_91 : i32 to vector<1x512xi32>
    %235 = arith.addi %18, %234 : vector<1x512xi32>
    %c16_i32_92 = arith.constant 16 : i32
    %236 = vector.broadcast %c16_i32_92 : i32 to vector<1x512xi32>
    %237 = arith.cmpi slt, %235, %236 : vector<1x512xi32>
    %238 = arith.andi %233, %237 : vector<1x512xi1>
    %cst_93 = arith.constant 0.000000e+00 : f32
    %239 = vector.shape_cast %238 : vector<1x512xi1> to vector<1x512xi1>
    %240 = vector.broadcast %239 : vector<1x512xi1> to vector<4x512xi1>
    %241 = vector.broadcast %cst_93 : f32 to vector<4x512xf32>
    %242 = arith.select %240, %219, %241 : vector<4x512xi1>, vector<4x512xf32>
    %c32 = arith.constant 32 : index
    %c0_94 = arith.constant 0 : index
    %243 = vector.load %arg6[%c32, %c0_94] : memref<37x512xf32, #tpu.memory_space<vmem>>, vector<4x512xf32>
    tpu.vector_store %arg6[%c32, %c0_94], %242 {strides = array<i32>} : memref<37x512xf32, #tpu.memory_space<vmem>>, vector<4x512xf32>,
    %cst_95 = arith.constant 1.000000e+00 : f32
    %244 = vector.broadcast %cst_95 : f32 to vector<1x512xf32>
    %c36 = arith.constant 36 : index
    %c0_96 = arith.constant 0 : index
    %245 = vector.load %arg6[%c36, %c0_96] : memref<37x512xf32, #tpu.memory_space<vmem>>, vector<1x512xf32>
    tpu.vector_store %arg6[%c36, %c0_96], %244 {strides = array<i32>} : memref<37x512xf32, #tpu.memory_space<vmem>>, vector<1x512xf32>,
    %c0_97 = arith.constant 0 : index
    %c0_98 = arith.constant 0 : index
    %246 = vector.load %arg2[%c0_97, %c0_98] : memref<32x37xf32, #tpu.memory_space<vmem>>, vector<32x37xf32>
    %c0_99 = arith.constant 0 : index
    %c0_100 = arith.constant 0 : index
    %247 = vector.load %arg6[%c0_99, %c0_100] : memref<37x512xf32, #tpu.memory_space<vmem>>, vector<37x512xf32>
    %cst_101 = arith.constant dense<0.000000e+00> : vector<32x512xf32>
    %248 = tpu.matmul %246, %247, %cst_101 {dimension_numbers = #tpu.dot_dimension_numbers<[1], [0], [0], [1], [0, 0, 1, 1], [], []>} : vector<32x37xf32>, vector<37x512xf32>, vector<32x512xf32> -> vector<32x512xf32>
    %cst_102 = arith.constant 0.000000e+00 : f32
    %249 = vector.broadcast %cst_102 : f32 to vector<32x512xf32>
    %250 = arith.maximumf %248, %249 : vector<32x512xf32>
    %c0_103 = arith.constant 0 : index
    %c0_104 = arith.constant 0 : index
    %251 = vector.load %arg3[%c0_103, %c0_104] : memref<8x32xf32, #tpu.memory_space<vmem>>, vector<8x32xf32>
    %cst_105 = arith.constant dense<0.000000e+00> : vector<8x512xf32>
    %252 = tpu.matmul %251, %250, %cst_105 {dimension_numbers = #tpu.dot_dimension_numbers<[1], [0], [0], [1], [0, 0, 1, 1], [], []>} : vector<8x32xf32>, vector<32x512xf32>, vector<8x512xf32> -> vector<8x512xf32>
    %c0_106 = arith.constant 0 : index
    %c0_107 = arith.constant 0 : index
    %253 = vector.load %arg4[%c0_106, %c0_107] : memref<8x1xf32, #tpu.memory_space<vmem>>, vector<8x1xf32>
    %254 = vector.broadcast %253 : vector<8x1xf32> to vector<8x512xf32>
    %255 = arith.addf %252, %254 : vector<8x512xf32>
    %256 = vector.extract_strided_slice %255 {offsets = [0, 0], sizes = [8, 256], strides = [1, 1]} : vector<8x512xf32> to vector<8x256xf32>
    %c0_108 = arith.constant 0 : index
    %c0_109 = arith.constant 0 : index
    %c0_110 = arith.constant 0 : index
    %257 = vector.load %arg5[%c0_108, %c0_109, %c0_110] : memref<2x8x256xf32, #tpu.memory_space<vmem>>, vector<1x8x256xf32>
    %258 = vector.shape_cast %257 : vector<1x8x256xf32> to vector<8x256xf32>
    %259 = vector.shape_cast %256 : vector<8x256xf32> to vector<1x8x256xf32>
    tpu.vector_store %arg5[%c0_108, %c0_109, %c0_110], %259 {strides = array<i32>} : memref<2x8x256xf32, #tpu.memory_space<vmem>>, vector<1x8x256xf32>,
    %260 = vector.extract_strided_slice %255 {offsets = [0, 256], sizes = [8, 256], strides = [1, 1]} : vector<8x512xf32> to vector<8x256xf32>
    %c1_111 = arith.constant 1 : index
    %c0_112 = arith.constant 0 : index
    %c0_113 = arith.constant 0 : index
    %261 = vector.load %arg5[%c1_111, %c0_112, %c0_113] : memref<2x8x256xf32, #tpu.memory_space<vmem>>, vector<1x8x256xf32>
    %262 = vector.shape_cast %261 : vector<1x8x256xf32> to vector<8x256xf32>
    %263 = vector.shape_cast %260 : vector<8x256xf32> to vector<1x8x256xf32>
    tpu.vector_store %arg5[%c1_111, %c0_112, %c0_113], %263 {strides = array<i32>} : memref<2x8x256xf32, #tpu.memory_space<vmem>>, vector<1x8x256xf32>,
    return
  }
}

</mosaic_0001>

<bundles_post_ra>
// kernel: model_wrapper_forward.1
= control target key start
LH: loop header
LB: loop body
LE: loop exit
PB: predicated region body
PF: predicated region fallthrough
CT: control target
= control target key end

     0   :  { %v887_v0 = vmov 0   ;;  %v888_v2 = vmov 0.0   ;;  %s889_s20 = smov 112   ;;  %s890_s21 = smov 111   ;;  %v47_v3 = vlaneseq  ;;  %v894_v5 = vmov 839922192   ;;  %s1518_s1 = inlined_call_operand.vmem [shape: f32[4,1], index: 1, kind: input, shape index: {}]   ;;  %s1519_s0 = inlined_call_operand.vmem [shape: f32[2,4,256], index: 0, kind: input, shape index: {}]   ;;  %s1520_s2 = inlined_call_operand.vmem [shape: f32[32,37], index: 2, kind: input, shape index: {}]   ;;  %s1521_s4 = inlined_call_operand.vmem [shape: f32[8,1], index: 4, kind: input, shape index: {}]   ;;  %s1522_s3 = inlined_call_operand.vmem [shape: f32[8,32], index: 3, kind: input, shape index: {}]   ;;  %s1523_s5 = inlined_call_operand.vmem [shape: f32[2,8,256], index: 5, kind: output, shape index: {}]  }
   0x1   :  { %885 = vset.pattern.permute.xlu0 %v887_v0  ;;  %v21_v1 = vld [vmem:[%s1518_s1] sm:$0xf]  ;;  %886 = vset.pattern.permute.xlu2 %v887_v0  ;;  %s891_s22 = smov 127   ;;  %s892_s23 = smov 113   ;;  %v27_v6 = vunpack.c.l.s4 %v894_v5  ;;  %v846_v21 = vld [vmem:[%s1519_s0 + $0x8] sm:$0xff]  ;;  %v1547_v22 = vmov 0 }
   0x2   :  { %24 = vperm.xlu0 %885, %v21_v1   ;;  %483 = vrot.lane.b32.xlu1 %v888_v2, %s889_s20  ;;  %s893_s1 = smov 1   ;;  %v943_v4 = vand.u32 127, %v47_v3  ;;  %v20_v12 = vld [vmem:[%s1519_s0] sm:$0xff]  ;;  %v1549_v24 = vmov 0  ;;  %s895_s0 = smov 16   ;;  %vm559_vm12 = vcmp.lt.s32.totalorder %v47_v3, 512 }
   0x3   :  { %v28_v8 = vunpack.c.0.s8 %v27_v6  ;;  %s896_s28 = smov 15   ;;  %s897_s29 = smov 17   ;;  %v898_v40 = vmov 1.0  }
   0x4   :  { %v946_v7 = vadd.s32 128, %v943_v4  ;;  %v52_v9 = vand.u32 255, %v943_v4  ;;  %v958_v15 = vadd.s32 384, %v943_v4  ;;  %v961_v17 = vadd.s32 256, %v943_v4 }
   0x5   :  { %562 = vst.msk [vmem:[#allocation2 + $0x84] ss:$8 sm:$0xf] %vm559_vm12, %v898_v40 }
   0x6   :  { %v53_v10 = vand.u32 255, %v946_v7  ;;  %v955_v14 = vshra.s32 %v52_v9, 4  ;;  %v55_v19 = vand.u32 255, %v958_v15  ;;  %v54_v20 = vand.u32 255, %v961_v17 }
   0x7   :  { %v1076_v51 = vand.u32 15, %v52_v9 }
   0x8   :  { %v965_v18 = vshra.s32 %v53_v10, 4  ;;  %vm254_vm0 = vcmp.ge.s32.totalorder %v955_v14, 0  ;;  %vm258_vm1 = vcmp.lt.s32.totalorder %v955_v14, 16  ;;  %v982_v23 = vshra.s32 %v55_v19, 4 }
   0x9   :  { %vm976_vm4 = vmand %vm254_vm0, %vm258_vm1  ;;  %v990_v26 = vshra.s32 %v54_v20, 4  ;;  %v1065_v46 = vand.u32 15, %v54_v20  ;;  %v63_v47 = vand.u32 15, %v55_v19  ;;  %v1092_v57 = vadd.s32 1, %v1076_v51 }
   0xa   :  { %538 = vrot.lane.b32.xlu0 %v888_v2, %s890_s21  ;;  %vm255_vm2 = vcmp.ge.s32.totalorder %v965_v18, 0  ;;  %vm259_vm3 = vcmp.lt.s32.totalorder %v965_v18, 16  ;;  %v1548_v22 = vsel %vm976_vm4, 4294967295, %v1547_v22  ;;  %vm257_vm6 = vcmp.ge.s32.totalorder %v982_v23, 0 }
   0xb   :  { %vm984_vm5 = vmand %vm255_vm2, %vm259_vm3  ;;  %vm261_vm7 = vcmp.lt.s32.totalorder %v982_v23, 16  ;;  %vm256_vm8 = vcmp.ge.s32.totalorder %v990_v26, 0  ;;  %vm260_vm9 = vcmp.lt.s32.totalorder %v990_v26, 16  ;;  %v402_v48 = vadd.s32 1, %v990_v26 }
   0xc   :  { %v1550_v24 = vsel %vm984_vm5, 4294967295, %v1549_v24  ;;  %vm1003_vm10 = vmand %vm257_vm6, %vm261_vm7  ;;  %v403_v49 = vadd.s32 1, %v982_v23  ;;  %v1072_v50 = vadd.s32 1, %v1065_v46  ;;  %v1078_v52 = vadd.s32 1, %v63_v47 }
   0xd   :  { %vm1007_vm11 = vmand %vm256_vm8, %vm260_vm9  ;;  %vm406_vm13 = vcmp.ge.s32.totalorder %v402_v48, 0  ;;  %vm410_vm14 = vcmp.lt.s32.totalorder %v402_v48, 16  ;;  %v401_v0 = vadd.s32 1, %v965_v18  ;;  %v1132_v6 = vadd.s32 4294967295, %v63_v47 }
   0xe   :  { %vm407_vm15 = vcmp.ge.s32.totalorder %v403_v49, 0  ;;  %vm411_vm0 = vcmp.lt.s32.totalorder %v403_v49, 16  ;;  %vm1526_vm1 = vcmp.ge.s32.totalorder %v1072_v50, 0  ;;  %vm1085_vm2 = vmand %vm406_vm13, %vm410_vm14  ;;  %vm1533_vm3 = vcmp.ge.s32.totalorder %v1078_v52, 0 }
   0xf   :  { %vm1095_vm6 = vmand %vm407_vm15, %vm411_vm0  ;;  %vm1527_vm7 = vcmp.lt.s32.totalorder %v1072_v50, 16  ;;  %vm1532_vm9 = vcmp.lt.s32.totalorder %v1078_v52, 16  ;;  %vm1529_vm13 = vcmp.lt.s32.totalorder %v1092_v57, 16  ;;  %vm1528_vm15 = vcmask 908288  }
  0x10   :  { %vm516_vm8 = vmand %vm1085_vm2, %vm1526_vm1  ;;  %vm1530_vm0 = vcmask 1039360  }
  0x11   :  { %vm517_vm12 = vmand %vm1095_vm6, %vm1533_vm3 }
  0x12   :  { %369 = vrot.lane.b32.xlu0 %v888_v2, %s891_s22  ;;  %vm520_vm14 = vmand %vm516_vm8, %vm1527_vm7  ;;  %vm409_vm7 = vcmp.lt.s32.totalorder %v401_v0, 16 }
  0x13   :  { %vm349_vm1 = vmand %vm976_vm4, %vm1529_vm13  ;;  %vm1535_vm13 = vcmask 916480  }
  0x14   :  { %vm348_vm8 = vmand %vm1003_vm10, %vm1533_vm3 }
  0x1a   :  { %440 = vrot.lane.b32.xlu0 %v888_v2, %s892_s23 }
  0x22   :  { %282 = vrot.lane.b32.xlu0 %v888_v2, %s893_s1 }
  0x74   :  { %v25_v11 = vpop.permute.xlu0 %24  ;;  %v1057_v43 = vpop.permute.xlu1 %483 }
  0x75   :  { %v29_v13 = vperm.slane %v25_v11, %v28_v8  ;;  %v1559_v11 = vmov 0 }
  0x77   :  { %v31_v16 = vsub.f32 %v20_v12, %v29_v13  ;;  %v34_v25 = vsub.f32 %v846_v21, %v29_v13 }
  0x79   :  { %36 = vst [vmem:[#allocation1] ss:$2 sm:$0xff] %v31_v16 }
  0x7c   :  { %v539_v37 = vpop.permute.xlu0 %538 }
  0x80   :  { %v37_v27 = vld.sshfl [vmem:[#allocation1] sm:$0xff pattern:$0x75316420]  ;;  %v38_v28 = vld.sshfl [vmem:[#allocation1 + $0x8] sm:$0xff pattern:$0x75316420] }
  0x81   :  { %42 = vst [vmem:[#allocation1] ss:$2 sm:$0xff] %v34_v25  ;;  %477 = vrot.lane.b32.xlu2 %v38_v28, %s889_s20  ;;  %286 = vrot.lane.b32.xlu1 %v38_v28, %s893_s1  ;;  %v337_v29 = vsel %vm976_vm4, %v37_v27, 0.0  ;;  %v338_v30 = vsel %vm984_vm5, %v38_v28, 0.0  ;;  %vm521_vm5 = vmand %vm517_vm12, %vm1532_vm9  ;;  %vm405_vm12 = vcmp.ge.s32.totalorder %v401_v0, 0 }
  0x82   :  { %530 = vrot.lane.b32.xlu0 %v37_v27, %s890_s21  ;;  %341 = vst [vmem:[#allocation2 + $0x40] sm:$0xf] %v337_v29  ;;  %v1170_v29 = vand.u32 15, %v53_v10 }
  0x83   :  { %342 = vst [vmem:[#allocation2 + $0x48] sm:$0xf] %v338_v30 }
  0x84   :  { %v1044_v38 = vpop.permute.xlu0 %369  ;;  %v1186_v7 = vadd.s32 1, %v1170_v29  ;;  %v1375_v32 = vadd.s32 4294967295, %v1170_v29 }
  0x88   :  { %v43_v33 = vld.sshfl [vmem:[#allocation1] sm:$0xff pattern:$0x75316420]  ;;  %v44_v34 = vld.sshfl [vmem:[#allocation1 + $0x8] sm:$0xff pattern:$0x75316420] }
  0x89   :  { %164 = vrot.lane.b32.xlu1 %v38_v28, %s895_s0  ;;  %361 = vrot.lane.b32.xlu2 %v37_v27, %s891_s22  ;;  %v340_v35 = vsel %vm1003_vm10, %v44_v34, 0.0  ;;  %v339_v36 = vsel %vm1007_vm11, %v43_v33, 0.0 }
  0x8a   :  { %363 = vrot.lane.b32.xlu0 %v38_v28, %s891_s22  ;;  %344 = vst [vmem:[#allocation2 + $0x58] sm:$0xf] %v340_v35 }
  0x8b   :  { %343 = vst [vmem:[#allocation2 + $0x50] sm:$0xf] %v339_v36 }
  0x8c   :  { %v1053_v41 = vpop.permute.xlu0 %440 }
  0x91   :  { %231 = vrot.lane.b32.xlu1 %v38_v28, %s896_s28  ;;  %434 = vrot.lane.b32.xlu2 %v38_v28, %s892_s23 }
  0x92   :  { %479 = vrot.lane.b32.xlu0 %v43_v33, %s889_s20 }
  0x94   :  { %v1059_v44 = vpop.permute.xlu0 %282 }
  0x99   :  { %113 = vrot.lane.b32.xlu1 %v38_v28, %s897_s29  ;;  %534 = vrot.lane.b32.xlu2 %v43_v33, %s890_s21 }
  0x9a   :  { %290 = vrot.lane.b32.xlu0 %v44_v34, %s893_s1 }
  0xa1   :  { %475 = vrot.lane.b32.xlu1 %v37_v27, %s889_s20  ;;  %536 = vrot.lane.b32.xlu2 %v44_v34, %s890_s21 }
  0xa2   :  { %168 = vrot.lane.b32.xlu0 %v44_v34, %s895_s0 }
  0xa9   :  { %532 = vrot.lane.b32.xlu1 %v38_v28, %s890_s21  ;;  %367 = vrot.lane.b32.xlu2 %v44_v34, %s891_s22  ;;  %v400_v28 = vadd.s32 1, %v955_v14 }
  0xaa   :  { %235 = vrot.lane.b32.xlu0 %v44_v34, %s896_s28 }
  0xb1   :  { %432 = vrot.lane.b32.xlu1 %v37_v27, %s892_s23  ;;  %438 = vrot.lane.b32.xlu2 %v44_v34, %s892_s23 }
  0xb2   :  { %117 = vrot.lane.b32.xlu0 %v44_v34, %s897_s29 }
  0xb9   :  { %481 = vrot.lane.b32.xlu1 %v44_v34, %s889_s20  ;;  %288 = vrot.lane.b32.xlu2 %v43_v33, %s893_s1 }
  0xba   :  { %162 = vrot.lane.b32.xlu0 %v37_v27, %s895_s0 }
  0xc1   :  { %365 = vrot.lane.b32.xlu1 %v43_v33, %s891_s22  ;;  %166 = vrot.lane.b32.xlu2 %v43_v33, %s895_s0 }
  0xc2   :  { %109 = vrot.lane.b32.xlu0 %v888_v2, %s897_s29 }
  0xc9   :  { %436 = vrot.lane.b32.xlu1 %v43_v33, %s892_s23  ;;  %233 = vrot.lane.b32.xlu2 %v43_v33, %s896_s28 }
  0xd1   :  { %284 = vrot.lane.b32.xlu1 %v37_v27, %s893_s1  ;;  %115 = vrot.lane.b32.xlu2 %v43_v33, %s897_s29 }
  0xd9   :  { %227 = vrot.lane.b32.xlu1 %v888_v2, %s896_s28  ;;  %160 = vrot.lane.b32.xlu2 %v888_v2, %s895_s0 }
  0xdb   :  { %v1050_v39 = vpop.permute.xlu2 %477 }
  0xe1   :  { %111 = vrot.lane.b32.xlu1 %v37_v27, %s897_s29  ;;  %229 = vrot.lane.b32.xlu2 %v37_v27, %s896_s28  ;;  %v1163_v27 = vadd.s32 4294967295, %v1065_v46 }
  0xe3   :  { %v362_v42 = vpop.permute.xlu2 %361 }
  0xeb   :  { %v1061_v45 = vpop.permute.xlu2 %434 }
  0xf3   :  { %v1080_v53 = vpop.permute.xlu1 %286  ;;  %v1082_v54 = vpop.permute.xlu2 %534 }
  0xf4   :  { %v1089_v56 = vpop.permute.xlu0 %530 }
  0xfb   :  { %v1114_v59 = vpop.permute.xlu1 %164  ;;  %v537_v60 = vpop.permute.xlu2 %536 }
  0xfc   :  { %v1120_v61 = vpop.permute.xlu0 %363  ;;  %v543_v62 = vsel %vm1528_vm15, %v1082_v54, %v537_v60  ;;  %v544_v63 = vsel %vm1528_vm15, %v537_v60, %v539_v37  ;;  %vm352_vm15 = vmand %vm348_vm8, %vm1532_vm9  ;;  %vm1534_vm8 = vcmask 924672   ;;  %vm408_vm9 = vcmp.lt.s32.totalorder %v400_v28, 16 }
  0xfd   :  { %v372_v1 = vsel %vm1530_vm0, %v362_v42, %v1120_v61  ;;  %v551_v2 = vsel %vm520_vm14, %v543_v62, 0.0  ;;  %v552_v3 = vsel %vm521_vm5, %v544_v63, 0.0  ;;  %vm1140_vm5 = vmand %vm405_vm12, %vm409_vm7  ;;  %vm1542_vm14 = vcmp.ge.s32.totalorder %v1132_v6, 0 }
  0xfe   :  { %v380_v4 = vsel %vm349_vm1, %v372_v1, 0.0  ;;  %555 = vst [vmem:[#allocation2 + $0x90] sm:$0xf] %v551_v2  ;;  %v1560_v11 = vsel %vm1140_vm5, 4294967295, %v1559_v11  ;;  %vm1531_vm1 = vcmask 1044480   ;;  %vm1536_vm7 = vcmp.lt.s32.totalorder %v1132_v6, 16 }
  0xff   :  { %v388_v5 = vrot.slane %v380_v4, 4  ;;  %556 = vst [vmem:[#allocation2 + $0x98] sm:$0xf] %v552_v3  ;;  %v67_v42 = vadd.s32 4294967295, %v982_v23  ;;  %v1236_v1 = vadd.s32 4294967295, %v1076_v51 }
 0x101   :  { %396 = vst [vmem:[#allocation2 + $0x40] sm:$0xf0] %v388_v5 }
 0x103   :  { %v1136_v8 = vpop.permute.xlu1 %231  ;;  %v1138_v9 = vpop.permute.xlu2 %367 }
 0x104   :  { %v375_v12 = vsel %vm1530_vm0, %v1138_v9, %v1044_v38  ;;  %v1147_v13 = vpop.permute.xlu0 %479  ;;  %vm1537_vm0 = vcmp.ge.s32.totalorder %v1163_v27, 0  ;;  %v66_v38 = vadd.s32 4294967295, %v990_v26 }
 0x105   :  { %v383_v15 = vsel %vm352_vm15, %v375_v12, 0.0  ;;  %v487_v16 = vsel %vm1535_vm13, %v1050_v39, %v1147_v13  ;;  %v586_v17 = vld [vmem:[#allocation2 + $0x90] sm:$0x1f]  ;;  %vm419_vm15 = vmand %vm1095_vm6, %vm1542_vm14 }
 0x106   :  { %v391_v19 = vrot.slane %v383_v15, 4  ;;  %v495_v20 = vsel %vm1140_vm5, %v487_v16, 0.0  ;;  %857 = vmatpush.msk.msra.mxu2 %vm1531_vm1, %v586_v17  ;;  %v587_v21 = vld [vmem:[#allocation2 + $0x98] sm:$0x1f]  ;;  %vm423_vm12 = vmand %vm419_vm15, %vm1536_vm7  ;;  %vm1541_vm15 = vcmp.lt.s32.totalorder %v1163_v27, 16  ;;  %vm1539_vm7 = vcmask 7168  }
 0x107   :  { %v503_v25 = vrot.slane %v495_v20, 4  ;;  %862 = vmatpush.msk.msra.mxu3 %vm1531_vm1, %v587_v21  ;;  %vm404_vm1 = vcmp.ge.s32.totalorder %v400_v28, 0  ;;  %vm268_vm3 = vmand %vm1007_vm11, %vm1537_vm0  ;;  %vm1565_vm0 = vcmp.lt.s32.totalorder %v1132_v6, 16 }
 0x108   :  { %399 = vst [vmem:[#allocation2 + $0x58] sm:$0xf0] %v391_v19  ;;  %vm1192_vm13 = vmand %vm404_vm1, %vm408_vm9  ;;  %vm1544_vm9 = vcmp.lt.s32.totalorder %v1186_v7, 16  ;;  %vm70_vm1 = vcmp.ge.s32.totalorder %v66_v38, 0 }
 0x109   :  { %511 = vst [vmem:[#allocation2 + $0x68] sm:$0xf0] %v503_v25 }
 0x10b   :  { %v1172_v30 = vpop.permute.xlu1 %113  ;;  %v1174_v33 = vpop.permute.xlu2 %438 }
 0x10c   :  { %v446_v34 = vsel %vm1534_vm8, %v1174_v33, %v1053_v41  ;;  %v291_v35 = vpop.permute.xlu0 %290  ;;  %vm269_vm8 = vmand %vm1003_vm10, %vm1542_vm14  ;;  %vm1540_vm10 = vcmp.ge.s32.totalorder %v1186_v7, 0 }
 0x10d   :  { %v454_v36 = vsel %vm423_vm12, %v446_v34, 0.0  ;;  %vm1198_vm12 = vmand %vm268_vm3, %vm1541_vm15  ;;  %vm1568_vm3 = vcmask 916480  }
 0x10e   :  { %458 = vst [vmem:[#allocation2 + $0x78] sm:$0xf] %v454_v36  ;;  %vm1205_vm4 = vmand %vm269_vm8, %vm1565_vm0  ;;  %vm74_vm8 = vcmp.lt.s32.totalorder %v66_v38, 16 }
 0x10f   :  { %vm515_vm0 = vmand %vm1140_vm5, %vm1540_vm10  ;;  %vm1545_vm5 = vcmp.ge.s32.totalorder %v1236_v1, 0 }
 0x110   :  { %vm1240_vm10 = vmand %vm515_vm0, %vm1544_vm9  ;;  %vm1578_vm0 = vcmask 908288  }
 0x111   :  { %vm1244_vm15 = vmand %vm70_vm1, %vm74_vm8 }
 0x112   :  { %vm1579_vm9 = vmmov %vm1578_vm0 }
 0x113   :  { %v476_v31 = vpop.permute.xlu1 %475  ;;  %v289_v41 = vpop.permute.xlu2 %288  ;;  %vm1280_vm8 = vmand %vm1192_vm13, %vm1545_vm5 }
 0x114   :  { %v486_v46 = vsel %vm1568_vm3, %v476_v31, %v1050_v39  ;;  %v295_v47 = vsel %vm1539_vm7, %v1080_v53, %v289_v41  ;;  %v296_v26 = vsel %vm1539_vm7, %v289_v41, %v291_v35  ;;  %v169_v48 = vpop.permute.xlu0 %168  ;;  %vm1569_vm3 = vcmp.lt.s32.totalorder %v1092_v57, 16 }
 0x115   :  { %v494_v49 = vsel %vm1192_vm13, %v486_v46, 0.0  ;;  %v303_v60 = vsel %vm1198_vm12, %v295_v47, 0.0  ;;  %v304_v23 = vsel %vm1205_vm4, %v296_v26, 0.0  ;;  %vm1231_vm7 = vmand %vm1192_vm13, %vm1569_vm3  ;;  %vm71_vm12 = vcmp.ge.s32.totalorder %v67_v42, 0 }
 0x116   :  { %v502_v39 = vrot.slane %v494_v49, 4  ;;  %v311_v62 = vrot.slane %v303_v60, 4  ;;  %v312_v63 = vrot.slane %v304_v23, 4  ;;  %vm75_vm4 = vcmp.lt.s32.totalorder %v67_v42, 16 }
 0x117   :  { %vm170_vm3 = vcmask 130048   ;;  %vm1248_vm14 = vmand %vm71_vm12, %vm75_vm4  ;;  %vm1584_vm12 = vcmp.lt.s32.totalorder %v1072_v50, 16  ;;  %vm1590_vm13 = vcmask 924672   ;;  %v65_v26 = vadd.s32 4294967295, %v965_v18  ;;  %v565_v18 = vld [vmem:[%s1520_s2 + $0x8] sm:$0xff] }
 0x118   :  { %510 = vst [vmem:[#allocation2 + $0x60] sm:$0xf0] %v502_v39  ;;  %v64_v39 = vadd.s32 4294967295, %v955_v14 }
 0x119   :  { %319 = vst [vmem:[#allocation2 + $0x30] sm:$0xf0] %v311_v62  ;;  %vm69_vm5 = vcmp.ge.s32.totalorder %v65_v26, 0 }
 0x11a   :  { %320 = vst [vmem:[#allocation2 + $0x38] sm:$0xf0] %v312_v63 }
 0x11b   :  { %v533_v51 = vpop.permute.xlu1 %532  ;;  %v167_v5 = vpop.permute.xlu2 %166 }
 0x11c   :  { %v541_v12 = vsel %vm1578_vm0, %v1089_v56, %v533_v51  ;;  %v542_v15 = vsel %vm1579_vm9, %v533_v51, %v1082_v54  ;;  %v173_v16 = vsel %vm170_vm3, %v1114_v59, %v167_v5  ;;  %v174_v17 = vsel %vm170_vm3, %v167_v5, %v169_v48  ;;  %v236_v19 = vpop.permute.xlu0 %235  ;;  %v567_v5 = vld [vmem:[%s1520_s2 + $0x18] sm:$0xff] }
 0x11d   :  { %v549_v20 = vsel %vm1231_vm7, %v541_v12, 0.0  ;;  %v550_v21 = vsel %vm1240_vm10, %v542_v15, 0.0  ;;  %v181_v25 = vsel %vm1244_vm15, %v173_v16, 0.0  ;;  %v182_v56 = vsel %vm1248_vm14, %v174_v17, 0.0  ;;  %v576_v17 = vld [vmem:[#allocation2 + $0x40] sm:$0xff] }
 0x11e   :  { %553 = vst [vmem:[#allocation2 + $0x80] sm:$0xf] %v549_v20  ;;  %v189_v54 = vrot.slane %v181_v25, 4  ;;  %v190_v28 = vrot.slane %v182_v56, 4  ;;  %vm1580_vm9 = vcmp.ge.s32.totalorder %v1072_v50, 0  ;;  %vm1581_vm7 = vcmp.ge.s32.totalorder %v1078_v52, 0 }
 0x11f   :  { %vm209_vm1 = vmand %vm1244_vm15, %vm1580_vm9  ;;  %554 = vst [vmem:[#allocation2 + $0x88] sm:$0xf] %v550_v21  ;;  %vm1546_vm0 = vcmask 121856   ;;  %vm1587_vm9 = vcmp.lt.s32.totalorder %v1078_v52, 16 }
 0x120   :  { %vm210_vm10 = vmand %vm1248_vm14, %vm1581_vm7  ;;  %197 = vst [vmem:[#allocation2 + $0x10] sm:$0xf0] %v189_v54 }
 0x121   :  { %198 = vst [vmem:[#allocation2 + $0x18] sm:$0xf0] %v190_v28  ;;  %vm1286_vm4 = vmand %vm209_vm1, %vm1584_vm12  ;;  %vm1591_vm1 = vcmask 1044480  }
 0x122   :  { %vm1292_vm7 = vmand %vm210_vm10, %vm1587_vm9  ;;  %vm1592_vm10 = vcmp.ge.s32.totalorder %v1163_v27, 0 }
 0x123   :  { %v433_v37 = vpop.permute.xlu1 %432  ;;  %v234_v10 = vpop.permute.xlu2 %233  ;;  %vm90_vm12 = vmand %vm1244_vm15, %vm1592_vm10  ;;  %vm1598_vm15 = vcmp.lt.s32.totalorder %v1132_v6, 16 }
 0x124   :  { %v443_v38 = vsel %vm1590_vm13, %v433_v37, %v1061_v45  ;;  %v240_v40 = vsel %vm1546_vm0, %v1136_v8, %v234_v10  ;;  %v241_v31 = vsel %vm1546_vm0, %v234_v10, %v236_v19  ;;  %v118_v41 = vpop.permute.xlu0 %117  ;;  %vm73_vm0 = vcmp.lt.s32.totalorder %v65_v26, 16  ;;  %v579_v10 = vld [vmem:[#allocation2 + $0x58] sm:$0xff] }
 0x125   :  { %v451_v42 = vsel %vm1280_vm8, %v443_v38, 0.0  ;;  %v248_v52 = vsel %vm1286_vm4, %v240_v40, 0.0  ;;  %v249_v46 = vsel %vm1292_vm7, %v241_v31, 0.0  ;;  %v584_v47 = vld [vmem:[#allocation2 + $0x80] sm:$0x1f]  ;;  %vm1593_vm8 = vmmov %vm1591_vm1  ;;  %vm1594_vm4 = vcmp.ge.s32.totalorder %v1132_v6, 0 }
 0x126   :  { %455 = vst [vmem:[#allocation2 + $0x60] sm:$0xf] %v451_v42  ;;  %847 = vmatpush.msk.msra.mxu0 %vm1591_vm1, %v584_v47  ;;  %v585_v48 = vld [vmem:[#allocation2 + $0x88] sm:$0x1f]  ;;  %vm91_vm9 = vmand %vm1248_vm14, %vm1594_vm4  ;;  %vm1595_vm7 = vcmp.lt.s32.totalorder %v1163_v27, 16  ;;  %vm119_vm1 = vcmask 138240  }
 0x127   :  { %252 = vst [vmem:[#allocation2 + $0x30] sm:$0xf] %v248_v52  ;;  %852 = vmatpush.msk.msra.mxu1 %vm1593_vm8, %v585_v48  ;;  %vm1320_vm13 = vmand %vm90_vm12, %vm1595_vm7  ;;  %vm1601_vm14 = vcmask 916480   ;;  %vm1605_vm4 = vcmp.ge.s32.totalorder %v1186_v7, 0  ;;  %vm68_vm7 = vcmp.ge.s32.totalorder %v64_v39, 0 }
 0x128   :  { %253 = vst [vmem:[#allocation2 + $0x38] sm:$0xf] %v249_v46  ;;  %vm1326_vm10 = vmand %vm91_vm9, %vm1598_vm15  ;;  %vm1610_vm15 = vcmp.lt.s32.totalorder %v1186_v7, 16  ;;  %v1433_v46 = vld [vmem:[%s1520_s2] sm:$0xff] }
 0x129   :  { %vm1602_vm12 = vmmov %vm1601_vm14 }
 0x12a   :  { %vm1338_vm8 = vmand %vm69_vm5, %vm73_vm0  ;;  %vm1606_vm5 = vnez %v1550_v24 }
 0x12b   :  { %v482_v60 = vpop.permute.xlu1 %481  ;;  %v116_v23 = vpop.permute.xlu2 %115  ;;  %vm1354_vm0 = vmand %vm1606_vm5, %vm1605_vm4  ;;  %vm1616_vm4 = vcmask 1039360  }
 0x12c   :  { %v488_v62 = vsel %vm1601_vm14, %v1147_v13, %v482_v60  ;;  %v489_v63 = vsel %vm1602_vm12, %v482_v60, %v1057_v43  ;;  %v122_v0 = vsel %vm119_vm1, %v1172_v30, %v116_v23  ;;  %v123_v2 = vsel %vm119_vm1, %v116_v23, %v118_v41  ;;  %v163_v3 = vpop.permute.xlu0 %162 }
 0x12d   :  { %v496_v4 = vsel %vm1085_vm2, %v488_v62, 0.0  ;;  %v497_v14 = vsel %vm1095_vm6, %v489_v63, 0.0  ;;  %v130_v13 = vsel %vm1320_vm13, %v122_v0, 0.0  ;;  %v131_v43 = vsel %vm1326_vm10, %v123_v2, 0.0  ;;  %v580_v51 = vld [vmem:[#allocation2 + $0x60] sm:$0xff]  ;;  %vm1370_vm10 = vmand %vm1354_vm0, %vm1610_vm15  ;;  %v566_v2 = vld [vmem:[%s1520_s2 + $0x10] sm:$0xff] }
 0x12e   :  { %v504_v12 = vrot.slane %v496_v4, 4  ;;  %v505_v15 = vrot.slane %v497_v14, 4  ;;  %134 = vst [vmem:[#allocation2 + $0x10] sm:$0xf] %v130_v13  ;;  %v172_v58 = vsel %vm170_vm3, %v163_v3, %v1114_v59  ;;  %626 = vmatpush.msra.mxu0 %v580_v51  ;;  %vm1609_vm6 = vcmp.ge.s32.totalorder %v1072_v50, 0  ;;  %vm1617_vm0 = vmmov %vm1616_vm4 }
 0x12f   :  { %vm347_vm9 = vmand %vm1007_vm11, %vm1609_vm6  ;;  %135 = vst [vmem:[#allocation2 + $0x18] sm:$0xf] %v131_v43  ;;  %v180_v16 = vsel %vm1338_vm8, %v172_v58, 0.0  ;;  %vm72_vm13 = vcmp.lt.s32.totalorder %v64_v39, 16  ;;  %vm1613_vm11 = vcmp.lt.s32.totalorder %v1072_v50, 16  ;;  %vm85_vm6 = vcmp.ge.s32.totalorder %v1375_v32, 0 }
 0x130   :  { %512 = vst [vmem:[#allocation2 + $0x70] sm:$0xf0] %v504_v12  ;;  %v188_v19 = vrot.slane %v180_v16, 4  ;;  %627 = vmatpush.msra.mxu0 %v576_v17  ;;  %vm351_vm14 = vmand %vm347_vm9, %vm1613_vm11  ;;  %vm1618_vm9 = vcmp.ge.s32.totalorder %v1163_v27, 0  ;;  %vm93_vm15 = vcmp.lt.s32.totalorder %v1375_v32, 16  ;;  %v575_v31 = vld [vmem:[#allocation2 + $0x38] sm:$0xff] }
 0x131   :  { %513 = vst [vmem:[#allocation2 + $0x78] sm:$0xf0] %v505_v15  ;;  %vm1379_vm12 = vmand %vm68_vm7, %vm72_vm13  ;;  %vm1619_vm13 = vcmp.ge.s32.totalorder %v1186_v7, 0 }
 0x132   :  { %196 = vst [vmem:[#allocation2 + $0x8] sm:$0xf0] %v188_v19  ;;  %vm418_vm7 = vmand %vm1085_vm2, %vm1618_vm9 }
 0x133   :  { %v366_v21 = vpop.permute.xlu1 %365  ;;  %v161_v25 = vpop.permute.xlu2 %160 }
 0x134   :  { %v373_v56 = vsel %vm1616_vm4, %v1120_v61, %v366_v21  ;;  %v374_v54 = vsel %vm1617_vm0, %v366_v21, %v1138_v9  ;;  %v171_v29 = vsel %vm170_vm3, %v161_v25, %v163_v3  ;;  %vm208_vm3 = vmand %vm1338_vm8, %vm1619_vm13  ;;  %vm1624_vm4 = vcmp.lt.s32.totalorder %v1186_v7, 16  ;;  %v110_v3 = vpop.permute.xlu0 %109 }
 0x135   :  { %v381_v50 = vsel %vm1370_vm10, %v373_v56, 0.0  ;;  %v382_v28 = vsel %vm351_vm14, %v374_v54, 0.0  ;;  %v179_v34 = vsel %vm1379_vm12, %v171_v29, 0.0  ;;  %vm1620_vm10 = vnez %v1560_v11  ;;  %vm1414_vm0 = vmand %vm208_vm3, %vm1624_vm4  ;;  %v570_v63 = vld [vmem:[#allocation2 + $0x10] sm:$0xff]  ;;  %v747_v56 = vld [vmem:[%s1521_s4] sm:$0xff] }
 0x136   :  { %v389_v61 = vrot.slane %v381_v50, 4  ;;  %v390_v35 = vrot.slane %v382_v28, 4  ;;  %v187_v36 = vrot.slane %v179_v34, 4  ;;  %vm417_vm11 = vmand %vm1620_vm10, %vm85_vm6  ;;  %vm1621_vm14 = vcmp.lt.s32.totalorder %v1163_v27, 16  ;;  %750 = vperm.xlu2 %886, %v747_v56   ;;  %v746_v50 = vld [vmem:[%s1522_s3] sm:$0xff] }
 0x137   :  { %vm1408_vm2 = vmand %vm418_vm7, %vm1621_vm14  ;;  %vm1627_vm7 = vcmask 924672   ;;  %vm1629_vm10 = vcmask 121856   ;;  %vm588_vm3 = vcmask 302080   ;;  %vm1630_vm14 = vcmp.ge.s32.totalorder %v1236_v1, 0 }
 0x138   :  { %397 = vst [vmem:[#allocation2 + $0x48] sm:$0xf0] %v389_v61  ;;  %v583_v9 = vld [vmem:[#allocation2 + $0x78] sm:$0xff]  ;;  %vm421_vm9 = vmand %vm417_vm11, %vm93_vm15 }
 0x139   :  { %398 = vst [vmem:[#allocation2 + $0x50] sm:$0xf0] %v390_v35  ;;  %713 = vmatpush.msra.mxu3 %v583_v9  ;;  %vm1628_vm13 = vmmov %vm1627_vm7 }
 0x13a   :  { %195 = vst [vmem:[#allocation2] sm:$0xf0] %v187_v36  ;;  %vm267_vm11 = vmand %vm1606_vm5, %vm85_vm6  ;;  %vm1634_vm5 = vcmp.lt.s32.totalorder %v1092_v57, 16 }
 0x13b   :  { %714 = vmatpush.msra.mxu3 %v579_v10  ;;  %v437_v11 = vpop.permute.xlu1 %436  ;;  %v230_v27 = vpop.permute.xlu2 %229 }
 0x13c   :  { %v444_v38 = vsel %vm1627_vm7, %v1061_v45, %v437_v11  ;;  %v445_v40 = vsel %vm1628_vm13, %v437_v11, %v1174_v33  ;;  %v239_v7 = vsel %vm1629_vm10, %v230_v27, %v1136_v8  ;;  %v571_v45 = vld [vmem:[#allocation2 + $0x18] sm:$0xff]  ;;  %vm215_vm13 = vmand %vm1379_vm12, %vm1634_vm5 }
 0x13d   :  { %v452_v41 = vsel %vm421_vm9, %v444_v38, 0.0  ;;  %v453_v42 = vsel %vm1408_vm2, %v445_v40, 0.0  ;;  %v247_v52 = vsel %vm1414_vm0, %v239_v7, 0.0  ;;  %715 = vmatpush.msra.mxu3 %v575_v31  ;;  %vm1631_vm2 = vnez %v1548_v22  ;;  %vm271_vm0 = vmand %vm267_vm11, %vm93_vm15 }
 0x13e   :  { %456 = vst [vmem:[#allocation2 + $0x68] sm:$0xf] %v452_v41  ;;  %vm266_vm4 = vmand %vm1631_vm2, %vm1630_vm14  ;;  %vm1632_vm9 = vcmask 7168   ;;  %vm1635_vm2 = vcmp.ge.s32.totalorder %v1236_v1, 0 }
 0x13f   :  { %457 = vst [vmem:[#allocation2 + $0x70] sm:$0xf] %v453_v42  ;;  %716 = vmatpush.msra.mxu3 %v571_v45  ;;  %vm1633_vm7 = vmmov %vm1632_vm9  ;;  %v577_v23 = vld [vmem:[#allocation2 + $0x48] sm:$0xff] }
 0x140   :  { %251 = vst [vmem:[#allocation2 + $0x28] sm:$0xf] %v247_v52  ;;  %863 = vmatmul.msk.f32.vlgmr.msra.gmra.mxu3 %vm588_vm3, %v1433_v46  ;;  %vm89_vm11 = vmand %vm1338_vm8, %vm85_vm6 }
 0x141   :  { %vm97_vm14 = vmand %vm89_vm11, %vm93_vm15 }
 0x143   :  { %v285_v8 = vpop.permute.xlu1 %284 }
 0x144   :  { %v293_v33 = vsel %vm1632_vm9, %v1059_v44, %v285_v8  ;;  %v294_v24 = vsel %vm1633_vm7, %v285_v8, %v1080_v53  ;;  %v578_v44 = vld [vmem:[#allocation2 + $0x50] sm:$0xff] }
 0x145   :  { %v301_v47 = vsel %vm266_vm4, %v293_v33, 0.0  ;;  %v302_v26 = vsel %vm271_vm0, %v294_v24, 0.0  ;;  %v581_v48 = vld [vmem:[#allocation2 + $0x68] sm:$0xff]  ;;  %v574_v53 = vld [vmem:[#allocation2 + $0x30] sm:$0xff]  ;;  %vm88_vm4 = vmand %vm1379_vm12, %vm1635_vm2 }
 0x146   :  { %v309_v49 = vrot.slane %v301_v47, 4  ;;  %v310_v22 = vrot.slane %v302_v26, 4  ;;  %655 = vmatpush.msra.mxu1 %v581_v48  ;;  %v582_v60 = vld [vmem:[#allocation2 + $0x70] sm:$0xff] }
 0x147   :  { %684 = vmatpush.msra.mxu2 %v582_v60 }
 0x148   :  { %317 = vst [vmem:[#allocation2 + $0x20] sm:$0xf0] %v309_v49  ;;  %864 = vmatmul.msk.f32.gmra.mxu3 %vm588_vm3, %v565_v18  ;;  %656 = vmatpush.msra.mxu1 %v577_v23 }
 0x149   :  { %318 = vst [vmem:[#allocation2 + $0x28] sm:$0xf0] %v310_v22  ;;  %685 = vmatpush.msra.mxu2 %v578_v44 }
 0x14b   :  { %686 = vmatpush.msra.mxu2 %v574_v53  ;;  %v228_v39 = vpop.permute.xlu1 %227 }
 0x14c   :  { %v238_v62 = vsel %vm1629_vm10, %v228_v39, %v230_v27 }
 0x14d   :  { %v246_v0 = vsel %vm215_vm13, %v238_v62, 0.0  ;;  %687 = vmatpush.msra.mxu2 %v570_v63 }
 0x14e   :  { %250 = vst [vmem:[#allocation2 + $0x20] sm:$0xf] %v246_v0  ;;  %858 = vmatmul.msk.f32.vlgmr.msra.gmra.mxu2 %vm588_vm3, %v1433_v46 }
 0x150   :  { %865 = vmatmul.msk.f32.gmra.mxu3 %vm588_vm3, %v566_v2  ;;  %v573_v57 = vld [vmem:[#allocation2 + $0x28] sm:$0xff] }
 0x151   :  { %657 = vmatpush.msra.mxu1 %v573_v57 }
 0x153   :  { %v112_v4 = vpop.permute.xlu1 %111 }
 0x154   :  { %v121_v14 = vsel %vm119_vm1, %v112_v4, %v1172_v30  ;;  %v120_v6 = vsel %vm119_vm1, %v110_v3, %v112_v4  ;;  %vm753_vm1 = vcmask 261120  }
 0x155   :  { %v129_v13 = vsel %vm97_vm14, %v121_v14, 0.0  ;;  %v128_v43 = vsel %vm88_vm4, %v120_v6, 0.0  ;;  %v572_v51 = vld [vmem:[#allocation2 + $0x20] sm:$0xff] }
 0x156   :  { %133 = vst [vmem:[#allocation2 + $0x8] sm:$0xf] %v129_v13  ;;  %859 = vmatmul.msk.f32.gmra.mxu2 %vm588_vm3, %v565_v18  ;;  %628 = vmatpush.msra.mxu0 %v572_v51 }
 0x157   :  { %132 = vst [vmem:[#allocation2] sm:$0xf] %v128_v43 }
 0x158   :  { %866 = vmatmul.msk.f32.gmra.mxu3 %vm588_vm3, %v567_v5 }
 0x15d   :  { %v569_v1 = vld [vmem:[#allocation2 + $0x8] sm:$0xff] }
 0x15e   :  { %860 = vmatmul.msk.f32.gmra.mxu2 %vm588_vm3, %v566_v2  ;;  %v568_v30 = vld [vmem:[#allocation2] sm:$0xff]  ;;  %658 = vmatpush.msra.mxu1 %v569_v1 }
 0x15f   :  { %629 = vmatpush.msra.mxu0 %v568_v30  ;;  %853 = vmatmul.msk.f32.vlgmr.msra.gmra.mxu1 %vm588_vm3, %v1433_v46 }
 0x160   :  { %848 = vmatmul.msk.f32.vlgmr.msra.gmra.mxu0 %vm588_vm3, %v1433_v46 }
 0x166   :  { %861 = vmatmul.msk.f32.gmra.mxu2 %vm588_vm3, %v567_v5 }
 0x167   :  { %854 = vmatmul.msk.f32.gmra.mxu1 %vm588_vm3, %v565_v18 }
 0x168   :  { %849 = vmatmul.msk.f32.gmra.mxu0 %vm588_vm3, %v565_v18 }
 0x16f   :  { %855 = vmatmul.msk.f32.gmra.mxu1 %vm588_vm3, %v566_v2 }
 0x170   :  { %850 = vmatmul.msk.f32.gmra.mxu0 %vm588_vm3, %v566_v2 }
 0x177   :  { %856 = vmatmul.msk.f32.gmra.mxu1 %vm588_vm3, %v567_v5 }
 0x178   :  { %851 = vmatmul.msk.f32.gmra.mxu0 %vm588_vm3, %v567_v5 }
 0x190   :  { %v751_v45 = vpop.permute.xlu2 %750 }
 0x1c3   :  { %v718_v12 = vpop.f32.mrf.mxu3 }
 0x1c4   :  { %v733_v29 = vmax.f32 %v718_v12, 0.0 }
 0x1cb   :  { %v721_v15 = vpop.f32.mrf.mxu3 }
 0x1cc   :  { %v737_v25 = vmax.f32 %v721_v15, 0.0 }
 0x1d1   :  { %v689_v58 = vpop.f32.mrf.mxu2 }
 0x1d2   :  { %v732_v10 = vmax.f32 %v689_v58, 0.0 }
 0x1d3   :  { %v724_v16 = vpop.f32.mrf.mxu3 }
 0x1d4   :  { %v741_v59 = vmax.f32 %v724_v16, 0.0 }
 0x1d9   :  { %v692_v17 = vpop.f32.mrf.mxu2 }
 0x1da   :  { %v736_v37 = vmax.f32 %v692_v17, 0.0 }
 0x1db   :  { %v727_v19 = vpop.f32.mrf.mxu3 }
 0x1dc   :  { %v745_v32 = vmax.f32 %v727_v19, 0.0  ;;  %v660_v20 = vpop.f32.mrf.mxu1 }
 0x1dd   :  { %v631_v21 = vpop.f32.mrf.mxu0  ;;  %v731_v52 = vmax.f32 %v660_v20, 0.0 }
 0x1de   :  { %829 = vmatpush.msrb.mxu3 %v745_v32  ;;  %v730_v46 = vmax.f32 %v631_v21, 0.0 }
 0x1e0   :  { %830 = vmatpush.msrb.mxu3 %v741_v59 }
 0x1e1   :  { %v695_v54 = vpop.f32.mrf.mxu2 }
 0x1e2   :  { %831 = vmatpush.msrb.mxu3 %v737_v25  ;;  %v740_v36 = vmax.f32 %v695_v54, 0.0 }
 0x1e4   :  { %832 = vmatpush.msrb.mxu3 %v733_v29  ;;  %v663_v28 = vpop.f32.mrf.mxu1 }
 0x1e5   :  { %v634_v34 = vpop.f32.mrf.mxu0  ;;  %870 = vmatmul.msk.f32.vlgmr.msrb.gmra.mxu3 %vm753_vm1, %v746_v50  ;;  %v735_v41 = vmax.f32 %v663_v28, 0.0 }
 0x1e6   :  { %v734_v42 = vmax.f32 %v634_v34, 0.0 }
 0x1e9   :  { %v698_v61 = vpop.f32.mrf.mxu2 }
 0x1ea   :  { %v744_v35 = vmax.f32 %v698_v61, 0.0 }
 0x1ec   :  { %809 = vmatpush.msrb.mxu2 %v744_v35  ;;  %v666_v9 = vpop.f32.mrf.mxu1 }
 0x1ed   :  { %v637_v55 = vpop.f32.mrf.mxu0  ;;  %v739_v7 = vmax.f32 %v666_v9, 0.0 }
 0x1ee   :  { %810 = vmatpush.msrb.mxu2 %v740_v36  ;;  %v738_v31 = vmax.f32 %v637_v55, 0.0 }
 0x1f0   :  { %811 = vmatpush.msrb.mxu2 %v736_v37 }
 0x1f2   :  { %812 = vmatpush.msrb.mxu2 %v732_v10 }
 0x1f3   :  { %869 = vmatmul.msk.f32.vlgmr.msrb.gmra.mxu2 %vm753_vm1, %v746_v50 }
 0x1f4   :  { %v669_v11 = vpop.f32.mrf.mxu1 }
 0x1f5   :  { %v640_v27 = vpop.f32.mrf.mxu0  ;;  %v743_v38 = vmax.f32 %v669_v11, 0.0 }
 0x1f6   :  { %v742_v40 = vmax.f32 %v640_v27, 0.0 }
 0x1f7   :  { %789 = vmatpush.msrb.mxu1 %v743_v38 }
 0x1f8   :  { %769 = vmatpush.msrb.mxu0 %v742_v40 }
 0x1f9   :  { %790 = vmatpush.msrb.mxu1 %v739_v7 }
 0x1fa   :  { %770 = vmatpush.msrb.mxu0 %v738_v31 }
 0x1fb   :  { %791 = vmatpush.msrb.mxu1 %v735_v41 }
 0x1fc   :  { %771 = vmatpush.msrb.mxu0 %v734_v42 }
 0x1fd   :  { %792 = vmatpush.msrb.mxu1 %v731_v52 }
 0x1fe   :  { %772 = vmatpush.msrb.mxu0 %v730_v46  ;;  %868 = vmatmul.msk.f32.vlgmr.msrb.gmra.mxu1 %vm753_vm1, %v746_v50 }
 0x1ff   :  { %867 = vmatmul.msk.f32.vlgmr.msrb.gmra.mxu0 %vm753_vm1, %v746_v50 }
 0x268   :  { %v834_v8 = vpop.f32.mrf.mxu3 }
 0x269   :  { %v835_v33 = vadd.f32 %v834_v8, %v751_v45 }
 0x26b   :  { %872 = vst [vmem:[%s1523_s5 + $0x18] sm:$0xff] %v835_v33 }
 0x276   :  { %v814_v24 = vpop.f32.mrf.mxu2 }
 0x277   :  { %v815_v47 = vadd.f32 %v814_v24, %v751_v45 }
 0x279   :  { %871 = vst [vmem:[%s1523_s5 + $0x10] sm:$0xff] %v815_v47 }
 0x27b   :  { %v794_v26 = vpop.f32.mrf.mxu1 }
 0x27c   :  { %v774_v48 = vpop.f32.mrf.mxu0  ;;  %v795_v18 = vadd.f32 %v794_v26, %v751_v45 }
 0x27d   :  { %v775_v49 = vadd.f32 %v774_v48, %v751_v45 }
 0x27e   :  { %838 = vst [vmem:[%s1523_s5 + $0x8] sm:$0xff] %v795_v18 }
 0x27f   :  { %837 = vst [vmem:[%s1523_s5] sm:$0xff] %v775_v49 }

</bundles_post_ra>
